<compile_context>
chip_gen: v6e
topology: v6e:2x2x1
jax: 0.10.0
libtpu: 0.0.40
codegen_flags: <defaults>
</compile_context>

<pallas_src>
import functools

import jax
import jax.numpy as jnp
from jax import lax
from jax.experimental import pallas as pl
from jax.experimental.pallas import tpu as pltpu

_MIB = 2 ** 20


# --------------------------------------------------------------------------- #
# Hardware-aware sizing helpers
# --------------------------------------------------------------------------- #
def _vmem_budget_bytes():
    """~80% of physical per-core VMEM (64 MiB on v7x, 128 MiB on v5e/v6e)."""
    try:
        cap = int(pltpu.get_tpu_info().vmem_capacity_bytes)
    except Exception:
        cap = 64 * _MIB          # conservative (v7x) fallback
    return int(0.8 * cap)


def _sublane_align(*dtypes):
    """Sublane multiple keeping stores dense for the narrowest dtype in play."""
    a = 8
    for dt in dtypes:
        isz = jnp.dtype(dt).itemsize
        if isz == 2:
            a = max(a, 16)
        elif isz == 1:
            a = max(a, 32)
    return a


def _aligned_divisors(n, align, cap):
    """Divisors of n, <= cap, multiples of `align` (or == n), descending."""
    divs = [c for c in range(min(n, cap), 0, -1)
            if n % c == 0 and (c % align == 0 or c == n)]
    return divs or [n]


def _pick_tile(n, align, cap):
    return _aligned_divisors(n, align, cap)[0]


def _dense_footprint_bytes(bb, bq, Lk, D, Dv, q_dtype, k_dtype, v_dtype,
                           attn_dtype, mask_shape):
    qs, ks, vs = (jnp.dtype(d).itemsize for d in (q_dtype, k_dtype, v_dtype))
    ats = jnp.dtype(attn_dtype).itemsize
    f = 2 * bb * bq * D * qs                 # q tiles (double-buffered)
    f += 2 * bb * Lk * D * ks                # k tiles
    f += 2 * bb * Lk * Dv * vs               # v tiles
    if mask_shape is not None:
        mb = bb if mask_shape[0] != 1 else 1
        mq = bq if mask_shape[1] != 1 else 1
        f += 2 * mb * mq * mask_shape[2]     # int8 mask tiles
    f += 2 * bb * bq * Dv * qs               # out tiles
    f += 2 * bb * bq * Lk * ats              # attn tiles
    f += 3 * bb * bq * Lk * 4                # f32 scores/exp temporaries
    return f


def _select_dense_tiles(B, Lq, Lk, D, Dv, q_dtype, k_dtype, v_dtype,
                        attn_dtype, mask_shape, budget):
    if Lq * Lk <= 128 * 128 and B > 1:
        # Tiny-shape regime: fold batch to amortize per-step overhead, but
        # keep >= 2 grid steps so both v7x TensorCores get work.
        target = max(1, B // 2)
        block_b = max(d for d in range(1, target + 1) if B % d == 0)
    else:
        block_b = 1

    align = _sublane_align(q_dtype, v_dtype, attn_dtype,
                           *((jnp.int8,) if mask_shape is not None else ()))
    cap = 512 if budget >= 96 * _MIB else 256   # 512 only on 128-MiB parts

    def pick_q(bb):
        for c in _aligned_divisors(Lq, align, cap):
            if _dense_footprint_bytes(bb, c, Lk, D, Dv, q_dtype, k_dtype,
                                      v_dtype, attn_dtype, mask_shape) <= budget:
                return c
        return None

    bq = pick_q(block_b)
    if bq is None and block_b > 1:
        block_b, bq = 1, pick_q(1)
    if bq is None:
        # Even the smallest aligned tile exceeds the budget (very long Lk).
        # TODO(synk): an Lk-tiled two-pass variant would remove full-Lk
        # residency for the attn-returning path as well.
        bq = _aligned_divisors(Lq, align, cap)[-1]
    return block_b, bq


def _flash_footprint_bytes(bq, bk, D, Dv, q_dtype, k_dtype, v_dtype, mask_shape):
    qs, ks, vs = (jnp.dtype(d).itemsize for d in (q_dtype, k_dtype, v_dtype))
    f = 2 * bq * D * qs + 2 * bk * D * ks + 2 * bk * Dv * vs
    if mask_shape is not None:
        mq = bq if mask_shape[1] != 1 else 1
        mk = bk if mask_shape[2] != 1 else 1
        f += 2 * mq * mk
    f += 2 * bq * Dv * qs            # out tiles
    f += 4 * bq * (Dv + 2)           # m/l/acc f32 scratch
    f += 3 * bq * bk * 4             # f32 score temporaries
    return f


def _select_flash_tiles(Lq, Lk, D, Dv, q_dtype, k_dtype, v_dtype,
                        mask_shape, budget):
    bq = _pick_tile(Lq, _sublane_align(q_dtype, v_dtype), 256)
    # block_k is the lane dim of the mask tile / sublane dim of the K,V tiles:
    # keep it a multiple of 128 (or the full Lk) so every access stays dense.
    cands = [c for c in range(min(Lk, 512), 0, -1)
             if Lk % c == 0 and (c % 128 == 0 or c == Lk)] or [Lk]
    for c in cands:
        if _flash_footprint_bytes(bq, c, D, Dv, q_dtype, k_dtype, v_dtype,
                                  mask_shape) <= budget:
            return bq, c
    return bq, cands[-1]


# --------------------------------------------------------------------------- #
# Kernels
# --------------------------------------------------------------------------- #
def _sdpa_dense_kernel(*refs, inv_temperature, has_mask, batched, scale_q):
    """One grid step: a (block_b, block_q) slab of queries vs. all keys.

    refs = (q, k, v, [mask], out, attn); with batched=False the batch dim of
    q/k/v/out/attn is squeezed (plain 2-D MXU matmuls); mask stays 3-D.
    """
    q_ref, k_ref, v_ref = refs[:3]
    i = 3
    mask_ref = None
    if has_mask:
        mask_ref = refs[i]
        i += 1
    out_ref, attn_ref = refs[i], refs[i + 1]

    q = q_ref[...]
    if scale_q:
        # Fold 1/temperature into q: block_q*D multiplies instead of block_q*Lk.
        q = q * inv_temperature
    k = k_ref[...]
    v = v_ref[...]

    if batched:
        dn_qk = (((2,), (2,)), ((0,), (0,)))
        dn_pv = (((2,), (1,)), ((0,), (0,)))
    else:
        dn_qk = (((1,), (1,)), ((), ()))
        dn_pv = (((1,), (0,)), ((), ()))

    # q @ k^T contracting the shared feature dim directly (no XLU transpose),
    # f32 accumulation on the MXU.
    scores = lax.dot_general(q, k, dimension_numbers=dn_qk,
                             preferred_element_type=jnp.float32)
    if not scale_q:
        scores = scores * inv_temperature

    if has_mask:
        # masked_fill(mask, -inf): fully-masked rows yield NaN, like torch.
        m = mask_ref[...]
        if not batched:
            m = m[0]
        scores = jnp.where(m != 0, -jnp.inf, scores)

    # Softmax over the key axis (torch dim=2).
    mx = jnp.max(scores, axis=-1, keepdims=True)
    e = jnp.exp(scores - mx)
    denom = jnp.sum(e, axis=-1, keepdims=True)
    r = pl.reciprocal(denom, approx=True)      # EUP slot
    r = r * (2.0 - denom * r)                  # one Newton step -> ~f32 accurate

    # Single cast of the (block_q, Lk) slab, reused for store and PV matmul.
    attn = (e * r).astype(attn_ref.dtype)
    attn_ref[...] = attn

    # TODO(synk): training-mode dropout (pltpu.prng_seed + stateful_bernoulli)
    # not implemented; eval-mode dropout is identity.

    out = lax.dot_general(attn.astype(v.dtype), v, dimension_numbers=dn_pv,
                          preferred_element_type=jnp.float32)
    out_ref[...] = out.astype(out_ref.dtype)


def _sdpa_flash_kernel(*refs, inv_temperature, has_mask, scale_q, mask_neg):
    """Lk-tiled online-softmax path (return_attn=False): no dense attn output,
    no full-Lk residency. Refs are 2-D (batch squeezed); mask stays 3-D."""
    q_ref, k_ref, v_ref = refs[:3]
    i = 3
    mask_ref = None
    if has_mask:
        mask_ref = refs[i]
        i += 1
    out_ref = refs[i]
    m_sc, l_sc, acc_sc = refs[i + 1], refs[i + 2], refs[i + 3]

    j = pl.program_id(2)

    @pl.when(j == 0)
    def _():
        m_sc[...] = jnp.full_like(m_sc, -jnp.inf)
        l_sc[...] = jnp.zeros_like(l_sc)
        acc_sc[...] = jnp.zeros_like(acc_sc)

    q = q_ref[...]
    if scale_q:
        q = q * inv_temperature
    s = lax.dot_general(q, k_ref[...],
                        dimension_numbers=(((1,), (1,)), ((), ())),
                        preferred_element_type=jnp.float32)
    if not scale_q:
        s = s * inv_temperature
    if has_mask:
        # Large finite negative keeps the online-softmax recurrence NaN-free
        # for partially masked rows.
        # TODO(synk): fully-masked rows give a uniform average here instead of
        # the torch NaN; use the dense path if that edge case matters.
        s = jnp.where(mask_ref[...][0] != 0, mask_neg, s)

    m_prev = m_sc[...]
    m_new = jnp.maximum(m_prev, jnp.max(s, axis=-1, keepdims=True))
    alpha = jnp.exp(m_prev - m_new)
    p = jnp.exp(s - m_new)
    l_sc[...] = alpha * l_sc[...] + jnp.sum(p, axis=-1, keepdims=True)
    acc_sc[...] = alpha * acc_sc[...] + lax.dot_general(
        p.astype(v_ref.dtype), v_ref[...],
        dimension_numbers=(((1,), (0,)), ((), ())),
        preferred_element_type=jnp.float32)
    m_sc[...] = m_new

    @pl.when(j == pl.num_programs(2) - 1)
    def _():
        denom = l_sc[...]
        r = pl.reciprocal(denom, approx=True)
        r = r * (2.0 - denom * r)
        out_ref[...] = (acc_sc[...] * r).astype(out_ref.dtype)


# --------------------------------------------------------------------------- #
# Wrappers
# --------------------------------------------------------------------------- #
def _flash_forward(q, k, v, mask_arr, inv_temperature, scale_q, budget,
                   block_q=None, block_k=None):
    B, Lq, D = q.shape
    _, Lk, _ = k.shape
    Dv = v.shape[-1]
    has_mask = mask_arr is not None
    mshape = mask_arr.shape if has_mask else None

    bq, bk = _select_flash_tiles(Lq, Lk, D, Dv, q.dtype, k.dtype, v.dtype,
                                 mshape, budget)
    if block_q is not None:
        bq = block_q
    if block_k is not None:
        bk = block_k
    assert Lq % bq == 0 and Lk % bk == 0

    fp = _flash_footprint_bytes(bq, bk, D, Dv, q.dtype, k.dtype, v.dtype, mshape)
    vmem_limit = int(min(max(int(fp * 1.25), 32 * _MIB), budget))

    grid = (B, Lq // bq, Lk // bk)
    in_arrays = [q, k, v]
    in_specs = [
        pl.BlockSpec((None, bq, D), lambda b, i, j: (b, i, 0)),
        pl.BlockSpec((None, bk, D), lambda b, i, j: (b, j, 0)),
        pl.BlockSpec((None, bk, Dv), lambda b, i, j: (b, j, 0)),
    ]
    if has_mask:
        mB, mQ, mK = mshape
        in_arrays.append(mask_arr)
        in_specs.append(pl.BlockSpec(
            (1, bq if mQ != 1 else 1, bk if mK != 1 else 1),
            lambda b, i, j, _b=(mB != 1), _q=(mQ != 1), _k=(mK != 1):
                (b if _b else 0, i if _q else 0, j if _k else 0)))

    kernel = functools.partial(_sdpa_flash_kernel,
                               inv_temperature=inv_temperature,
                               has_mask=has_mask, scale_q=scale_q,
                               mask_neg=float(jnp.finfo(jnp.float32).min))

    return pl.pallas_call(
        kernel,
        out_shape=jax.ShapeDtypeStruct((B, Lq, Dv), q.dtype),
        grid=grid,
        in_specs=in_specs,
        out_specs=pl.BlockSpec((None, bq, Dv), lambda b, i, j: (b, i, 0)),
        scratch_shapes=[pltpu.VMEM((bq, 1), jnp.float32),
                        pltpu.VMEM((bq, 1), jnp.float32),
                        pltpu.VMEM((bq, Dv), jnp.float32)],
        compiler_params=pltpu.CompilerParams(
            dimension_semantics=("parallel", "parallel", "arbitrary"),
            vmem_limit_bytes=vmem_limit),
    )(*in_arrays)


def scaled_dot_product_attention(q, k, v, temperature, mask=None, *,
                                 return_attn=True, attn_dtype=None,
                                 block_q=None, block_b=None, block_k=None):
    """Matches ScaledDotProductAttention.forward: returns (output, attn).
    With return_attn=False returns only `output` via the flash (Lk-tiled) path.
    """
    B, Lq, D = q.shape
    Bk, Lk, Dk = k.shape
    Bv, Lkv, Dv = v.shape
    assert Bk == B and Bv == B and Lkv == Lk and Dk == D

    attn_dtype = jnp.dtype(attn_dtype) if attn_dtype is not None else jnp.dtype(q.dtype)
    inv_temperature = 1.0 / float(temperature)
    scale_q = jnp.dtype(q.dtype).itemsize == 4   # fold 1/T into q only at f32

    has_mask = mask is not None
    mask_arr = None
    if has_mask:
        mask_arr = jnp.asarray(mask)
        if mask_arr.ndim == 2:
            mask_arr = mask_arr[None]
        assert mask_arr.ndim == 3
        for ax, full in enumerate((B, Lq, Lk)):
            assert mask_arr.shape[ax] in (1, full), "mask must broadcast to (B,Lq,Lk)"
        # int8 mask stream (4x less HBM traffic than int32); broadcast axes are
        # NOT materialized -- they get size-1 blocks with index 0 below.
        mask_arr = mask_arr.astype(jnp.int8)

    budget = _vmem_budget_bytes()

    if not return_attn:
        return _flash_forward(q, k, v, mask_arr, inv_temperature, scale_q,
                              budget, block_q, block_k)

    # ------------------- dense path: (output, attn) ------------------------ #
    mshape = mask_arr.shape if has_mask else None
    bb, bq = _select_dense_tiles(B, Lq, Lk, D, Dv, q.dtype, k.dtype, v.dtype,
                                 attn_dtype, mshape, budget)
    if block_b is not None:
        bb = block_b
    if block_q is not None:
        bq = block_q
    assert B % bb == 0 and Lq % bq == 0

    fp = _dense_footprint_bytes(bb, bq, Lk, D, Dv, q.dtype, k.dtype, v.dtype,
                                attn_dtype, mshape)
    vmem_limit = int(min(max(int(fp * 1.25), 32 * _MIB), budget))

    squeeze = bb == 1
    bdim = (None,) if squeeze else (bb,)
    grid = (B // bb, Lq // bq)

    in_arrays = [q, k, v]
    in_specs = [
        pl.BlockSpec(bdim + (bq, D), lambda b, i: (b, i, 0)),
        pl.BlockSpec(bdim + (Lk, D), lambda b, i: (b, 0, 0)),   # K resident per batch block
        pl.BlockSpec(bdim + (Lk, Dv), lambda b, i: (b, 0, 0)),  # V resident per batch block
    ]
    if has_mask:
        mB, mQ, mK = mask_arr.shape
        in_arrays.append(mask_arr)
        in_specs.append(pl.BlockSpec(
            (bb if mB != 1 else 1, bq if mQ != 1 else 1, mK),
            lambda b, i, _b=(mB != 1), _q=(mQ != 1):
                (b if _b else 0, i if _q else 0, 0)))

    out_shape = (jax.ShapeDtypeStruct((B, Lq, Dv), q.dtype),
                 jax.ShapeDtypeStruct((B, Lq, Lk), attn_dtype))
    out_specs = (pl.BlockSpec(bdim + (bq, Dv), lambda b, i: (b, i, 0)),
                 pl.BlockSpec(bdim + (bq, Lk), lambda b, i: (b, i, 0)))

    kernel = functools.partial(_sdpa_dense_kernel,
                               inv_temperature=inv_temperature,
                               has_mask=has_mask,
                               batched=not squeeze,
                               scale_q=scale_q)

    out, attn = pl.pallas_call(
        kernel,
        out_shape=out_shape,
        grid=grid,
        in_specs=in_specs,
        out_specs=out_specs,
        compiler_params=pltpu.CompilerParams(
            dimension_semantics=("parallel", "parallel"),
            vmem_limit_bytes=vmem_limit),
    )(*in_arrays)
    return out, attn


# --------------------------------------------------------------------------- #
# Reference + tests
# --------------------------------------------------------------------------- #
def _reference(q, k, v, temperature, mask=None):
    attn = jnp.einsum("bqd,bkd->bqk", q.astype(jnp.float32),
                      k.astype(jnp.float32)) / temperature
    if mask is not None:
        m = jnp.broadcast_to(jnp.asarray(mask, bool), attn.shape)
        attn = jnp.where(m, -jnp.inf, attn)
    attn = jax.nn.softmax(attn, axis=2)
    out = jnp.einsum("bqk,bkd->bqd", attn.astype(v.dtype), v)
    return out, attn


if __name__ == "__main__":
    B, Lq, Lk, D, Dv = 2, 8, 8, 32, 32
    temperature = float(D) ** 0.5

    key = jax.random.PRNGKey(0)
    kq, kk, kv = jax.random.split(key, 3)
    q = jax.random.normal(kq, (B, Lq, D), jnp.float32)
    k = jax.random.normal(kk, (B, Lk, D), jnp.float32)
    v = jax.random.normal(kv, (B, Lk, Dv), jnp.float32)

    # --- dense path, no mask (squeezed-batch kernel, 2 grid steps for 2 TCs) --
    out, attn = scaled_dot_product_attention(q, k, v, temperature)
    jax.block_until_ready((out, attn))
    out_r, attn_r = _reference(q, k, v, temperature)
    assert out.shape == (B, Lq, Dv) and attn.shape == (B, Lq, Lk)
    assert jnp.allclose(out, out_r, atol=1e-5, rtol=1e-5)
    assert jnp.allclose(attn, attn_r, atol=1e-5, rtol=1e-5)

    # --- dense path, broadcast (B,1,Lk) padding mask (not materialized) -------
    mask_b = jnp.zeros((B, 1, Lk), jnp.bool_).at[:, :, -1].set(True)
    out_m, attn_m = scaled_dot_product_attention(q, k, v, temperature, mask=mask_b)
    jax.block_until_ready((out_m, attn_m))
    out_mr, attn_mr = _reference(q, k, v, temperature, mask=mask_b)
    assert jnp.allclose(out_m, out_mr, atol=1e-5, rtol=1e-5)
    assert jnp.allclose(attn_m, attn_mr, atol=1e-5, rtol=1e-5)

    # --- dense path, batched tiny-shape fold (B=4 -> block_b=2) + full mask ---
    B4 = 4
    k4q, k4k, k4v = jax.random.split(jax.random.PRNGKey(1), 3)
    q4 = jax.random.normal(k4q, (B4, Lq, D), jnp.float32)
    k4 = jax.random.normal(k4k, (B4, Lk, D), jnp.float32)
    v4 = jax.random.normal(k4v, (B4, Lk, Dv), jnp.float32)
    mask4 = jnp.zeros((B4, Lq, Lk), jnp.bool_).at[:, 1::2, -2:].set(True)
    out4, attn4 = scaled_dot_product_attention(q4, k4, v4, temperature, mask=mask4)
    jax.block_until_ready((out4, attn4))
    out4_r, attn4_r = _reference(q4, k4, v4, temperature, mask=mask4)
    assert jnp.allclose(out4, out4_r, atol=1e-5, rtol=1e-5)
    assert jnp.allclose(attn4, attn4_r, atol=1e-5, rtol=1e-5)

    # --- flash path (return_attn=False, Lk-tiled online softmax) --------------
    mask_f = jnp.zeros((B, Lq, Lk), jnp.bool_).at[:, :, -1].set(True)
    out_fl = scaled_dot_product_attention(q, k, v, temperature, mask=mask_f,
                                          return_attn=False)
    out_fl = jax.block_until_ready(out_fl)
    out_fl_r, _ = _reference(q, k, v, temperature, mask=mask_f)
    assert jnp.allclose(out_fl, out_fl_r, atol=1e-5, rtol=1e-5)

    print("KERNEL_OK")
</pallas_src>

<mosaic_0001>
module attributes {stable_mosaic.version = 11 : i64} {
  func.func @_sdpa_dense_kernel(%arg0: i32, %arg1: i32, %arg2: memref<1x8x32xf32, #tpu.memory_space<vmem>>, %arg3: memref<1x8x32xf32, #tpu.memory_space<vmem>>, %arg4: memref<1x8x32xf32, #tpu.memory_space<vmem>>, %arg5: memref<1x8x32xf32, #tpu.memory_space<vmem>>, %arg6: memref<1x8x8xf32, #tpu.memory_space<vmem>>) attributes {dimension_semantics = [#tpu.dimension_semantics<parallel>, #tpu.dimension_semantics<parallel>], iteration_bounds = array<i64: 2, 1>, scalar_prefetch = 0 : i64, scratch_operands = 0 : i64, tpu.core_type = #tpu.core_type<tc>, window_params = [{transform_indices = @transform_0, window_bounds = array<i64: 1, 8, 32>}, {transform_indices = @transform_1, window_bounds = array<i64: 1, 8, 32>}, {transform_indices = @transform_2, window_bounds = array<i64: 1, 8, 32>}, {transform_indices = @transform_3, window_bounds = array<i64: 1, 8, 32>}, {transform_indices = @transform_4, window_bounds = array<i64: 1, 8, 8>}]} {
    %c0 = arith.constant 0 : index
    %c0_0 = arith.constant 0 : index
    %c0_1 = arith.constant 0 : index
    %0 = vector.load %arg2[%c0, %c0_0, %c0_1] : memref<1x8x32xf32, #tpu.memory_space<vmem>>, vector<1x8x32xf32>
    %1 = vector.shape_cast %0 : vector<1x8x32xf32> to vector<8x32xf32>
    %cst = arith.constant 0.176776692 : f32
    %2 = vector.broadcast %cst : f32 to vector<8x32xf32>
    %3 = arith.mulf %1, %2 : vector<8x32xf32>
    %c0_2 = arith.constant 0 : index
    %c0_3 = arith.constant 0 : index
    %c0_4 = arith.constant 0 : index
    %4 = vector.load %arg3[%c0_2, %c0_3, %c0_4] : memref<1x8x32xf32, #tpu.memory_space<vmem>>, vector<1x8x32xf32>
    %5 = vector.shape_cast %4 : vector<1x8x32xf32> to vector<8x32xf32>
    %c0_5 = arith.constant 0 : index
    %c0_6 = arith.constant 0 : index
    %c0_7 = arith.constant 0 : index
    %6 = vector.load %arg4[%c0_5, %c0_6, %c0_7] : memref<1x8x32xf32, #tpu.memory_space<vmem>>, vector<1x8x32xf32>
    %7 = vector.shape_cast %6 : vector<1x8x32xf32> to vector<8x32xf32>
    %cst_8 = arith.constant dense<0.000000e+00> : vector<8x8xf32>
    %8 = tpu.matmul %3, %5, %cst_8 {dimension_numbers = #tpu.dot_dimension_numbers<[1], [1], [0], [0], [0, 0, 1, 0], [], []>} : vector<8x32xf32>, vector<8x32xf32>, vector<8x8xf32> -> vector<8x8xf32>
    %cst_9 = arith.constant dense<0xFF800000> : vector<8xf32>
    %9 = vector.multi_reduction <maximumf>, %8, %cst_9 [1] : vector<8x8xf32> to vector<8xf32>
    %10 = vector.shape_cast %9 : vector<8xf32> to vector<8x1xf32>
    %11 = vector.broadcast %10 : vector<8x1xf32> to vector<8x8xf32>
    %12 = arith.subf %8, %11 : vector<8x8xf32>
    %13 = math.exp %12 : vector<8x8xf32>
    %cst_10 = arith.constant dense<0.000000e+00> : vector<8xf32>
    %14 = vector.multi_reduction <add>, %13, %cst_10 [1] : vector<8x8xf32> to vector<8xf32>
    %15 = vector.shape_cast %14 : vector<8xf32> to vector<8x1xf32>
    %16 = tpu.reciprocal %15 {approx = true} : vector<8x1xf32> -> vector<8x1xf32>
    %17 = arith.mulf %15, %16 : vector<8x1xf32>
    %cst_11 = arith.constant 2.000000e+00 : f32
    %18 = vector.broadcast %cst_11 : f32 to vector<8x1xf32>
    %19 = arith.subf %18, %17 : vector<8x1xf32>
    %20 = arith.mulf %16, %19 : vector<8x1xf32>
    %21 = vector.broadcast %20 : vector<8x1xf32> to vector<8x8xf32>
    %22 = arith.mulf %13, %21 : vector<8x8xf32>
    %c0_12 = arith.constant 0 : index
    %c0_13 = arith.constant 0 : index
    %c0_14 = arith.constant 0 : index
    %23 = vector.load %arg6[%c0_12, %c0_13, %c0_14] : memref<1x8x8xf32, #tpu.memory_space<vmem>>, vector<1x8x8xf32>
    %24 = vector.shape_cast %23 : vector<1x8x8xf32> to vector<8x8xf32>
    %25 = vector.shape_cast %22 : vector<8x8xf32> to vector<1x8x8xf32>
    tpu.vector_store %arg6[%c0_12, %c0_13, %c0_14], %25 {strides = array<i32>} : memref<1x8x8xf32, #tpu.memory_space<vmem>>, vector<1x8x8xf32>,
    %cst_15 = arith.constant dense<0.000000e+00> : vector<8x32xf32>
    %26 = tpu.matmul %22, %7, %cst_15 {dimension_numbers = #tpu.dot_dimension_numbers<[1], [0], [0], [1], [0, 0, 1, 1], [], []>} : vector<8x8xf32>, vector<8x32xf32>, vector<8x32xf32> -> vector<8x32xf32>
    %c0_16 = arith.constant 0 : index
    %c0_17 = arith.constant 0 : index
    %c0_18 = arith.constant 0 : index
    %27 = vector.load %arg5[%c0_16, %c0_17, %c0_18] : memref<1x8x32xf32, #tpu.memory_space<vmem>>, vector<1x8x32xf32>
    %28 = vector.shape_cast %27 : vector<1x8x32xf32> to vector<8x32xf32>
    %29 = vector.shape_cast %26 : vector<8x32xf32> to vector<1x8x32xf32>
    tpu.vector_store %arg5[%c0_16, %c0_17, %c0_18], %29 {strides = array<i32>} : memref<1x8x32xf32, #tpu.memory_space<vmem>>, vector<1x8x32xf32>,
    return
  }
  func.func @transform_0(%arg0: i32, %arg1: i32) -> (i32, i32, i32) {
    %c0_i32 = arith.constant 0 : i32
    %c0_i32_0 = arith.constant 0 : i32
    return %arg0, %arg1, %c0_i32 : i32, i32, i32
  }
  func.func @transform_1(%arg0: i32, %arg1: i32) -> (i32, i32, i32) {
    %c0_i32 = arith.constant 0 : i32
    %c0_i32_0 = arith.constant 0 : i32
    %c0_i32_1 = arith.constant 0 : i32
    return %arg0, %c0_i32, %c0_i32_0 : i32, i32, i32
  }
  func.func @transform_2(%arg0: i32, %arg1: i32) -> (i32, i32, i32) {
    %c0_i32 = arith.constant 0 : i32
    %c0_i32_0 = arith.constant 0 : i32
    %c0_i32_1 = arith.constant 0 : i32
    return %arg0, %c0_i32, %c0_i32_0 : i32, i32, i32
  }
  func.func @transform_3(%arg0: i32, %arg1: i32) -> (i32, i32, i32) {
    %c0_i32 = arith.constant 0 : i32
    %c0_i32_0 = arith.constant 0 : i32
    return %arg0, %arg1, %c0_i32 : i32, i32, i32
  }
  func.func @transform_4(%arg0: i32, %arg1: i32) -> (i32, i32, i32) {
    %c0_i32 = arith.constant 0 : i32
    %c0_i32_0 = arith.constant 0 : i32
    return %arg0, %arg1, %c0_i32 : i32, i32, i32
  }
}

</mosaic_0001>

<bundles_post_ra>
// kernel: tpu_custom_call.1
= control target key start
LH: loop header
LB: loop body
LE: loop exit
PB: predicated region body
PF: predicated region fallthrough
CT: control target
= control target key end

     0   :  { %s1267_s0 = inlined_call_operand.hbm [shape: f32[2,8,32], index: 0, kind: input, shape index: {}]   ;;  %s1268_s1 = inlined_call_operand.hbm [shape: f32[2,8,32], index: 1, kind: input, shape index: {}]   ;;  %s1269_s2 = inlined_call_operand.hbm [shape: f32[2,8,32], index: 2, kind: input, shape index: {}]   ;;  %s1270_s3 = inlined_call_operand.hbm [shape: f32[2,8,32], index: 3, kind: output, shape index: {0}]   ;;  %s1271_s4 = inlined_call_operand.hbm [shape: f32[2,8,8], index: 4, kind: output, shape index: {1}]  }
   0x1   :  { %1275 = sst [smem:[#allocation18_spill]] %s1268_s1 }
   0x2   :  { %10 = vsyncpa [#allocation3], 0 }
   0x3   :  { %12 = vsyncpa [#allocation3 + $0x1], 0 }
   0x4   :  { %13 = vsyncpa [#allocation6], 0 }
   0x5   :  { %15 = vsyncpa [#allocation6 + $0x1], 0 }
   0x6   :  { %16 = vsyncpa [#allocation4], 0 }
   0x7   :  { %18 = vsyncpa [#allocation4 + $0x1], 0 }
   0x8   :  { %19 = vsyncpa [#allocation10], 0 }
   0x9   :  { %21 = vsyncpa [#allocation10 + $0x1], 0  ;;  %s1029_s15 = smov 0   ;;  %s1031_s16 = smov 0  }
   0xa   :  { %s1033_s17 = smov 0   ;;  %s1035_s18 = smov 0  }
   0xb   :  { %s1037_s19 = smov 0   ;;  %s1039_s20 = smov 0  }
   0xc LB: > { %1276 = sst [smem:[#allocation15_spill]] %s991_s19  ;;  %s1060_s21 = sadd.s32 4294967295, %s995_s20   ;;  %s995_s20 = sphi %s1039_s20, %s27_s20   ;;  %s991_s19 = sphi %s1037_s19, %s1290_s19   ;;  %s987_s18 = sphi %s1035_s18, %s1289_s18   ;;  %s983_s17 = sphi %s1033_s17, %s1293_s17   ;;  %s979_s16 = sphi %s1031_s16, %s1292_s16   ;;  %s975_s15 = sphi %s1029_s15, %s1291_s15  }
   0xd   : > { %s676_s22 = sadd.s32 4294967294, %s995_s20   ;;  %s39_s23 = sadd.s32 1, %s991_s19 }
   0xe   : > { %s48_s24 = sadd.s32 1, %s983_s17  ;;  %p41_p0 = scmp.ge.s32.totalorder %s39_s23, 2 }
   0xf   : > { %p55_p1 = scmp.ne.s32.totalorder %s983_s17, %s979_s16  ;;  %p56_p2 = scmp.eq.s32.totalorder %s995_s20, 0 }
  0x10   : > { %p61_p3 = scmp.ne.s32.totalorder %s979_s16, %s975_s15  ;;  %s1295_s23 = smov (%p41_p0, %s39_s23), 0 }
  0x11   : > { %1277 = sst [smem:[#allocation16_spill]] %s1295_s23  ;;  %p1072_p4 = por %p56_p2, %p55_p1 }
  0x12   : > { %p62_p5 = scmp.eq.s32.totalorder %s1060_s21, 0  ;;  %s43_s26 = ssub.s32 %s991_s19, %s1295_s23 }
  0x13   : > { %p139_p6 = scmp.eq.s32.totalorder %s1060_s21, 1  ;;  %p46_p7 = scmp.eq.s32.totalorder %s43_s26, 0 }
  0x14   : > { %p1080_p8 = por %p62_p5, %p61_p3  ;;  %p145_p10 = scmp.eq.s32.totalorder %s676_s22, 1 }
  0x15   : > { %p1084_p9 = por %p139_p6, %p55_p1  ;;  %p741_p13 = scmp.lt.s32.totalorder %s995_s20, 2 }
  0x16   : > { %s1089_s29 = scalar_select %p46_p7, %s983_s17, %s48_s24  }
  0x17   : > { %p1091_p11 = por %p145_p10, %p61_p3  ;;  %s1272_s5 = sand.u32 1, %s983_s17  }
  0x18   : > { %1281 = sst [smem:[#allocation17_spill]] %s1089_s29  ;;  %s1100_s6 = sshll.u32 %s1272_s5, 3 }
  0x19   : > { %s1103_s7 = sshll.u32 %s991_s19, 7  ;;  %p1107_p0 = pnand %p741_p13, %p1072_p4 }
  0x1a   : > { %s212_s9 = sand.u32 1, %s995_s20   ;;  %s1284_s1 = sld [smem:[#allocation18_spill]] }
  0x1b   : > { %s216_s13 = scalar_lea.vmem [#allocation5], %s1100_s6  ;;  %p685_p1 = scmp.ge.s32.totalorder %s995_s20, 1 }
  0x1c   : > { %s223_s14 = sshll.u32 %s216_s13, 4  ;;  %p246_p2 = scmp.lt.s32.totalorder %s995_s20, 3  ;;  %s224_s14 = int_to_ptr.vmem [resolvable:$true] %s223_s14 }
  0x1d   : > { %s1119_s22 = scalar_lea.sflag [#allocation6], %s212_s9  ;;  %p799_p3 = pneg %p1107_p0 }
  0x1e   : > { %s810_s24 = scalar_lea.vmem %s224_s14, 128  ;;  %s997_s25 = smov [#allocation5]  }
  0x1f   : > { %p811_p4 = scmp.ne.s32.totalorder %s224_s14, %s810_s24  ;;  %s815_s26 = sshll.u32 %s997_s25, 4  ;;  %s816_s26 = int_to_ptr.vmem [resolvable:$false] %s815_s26 }
  0x20   : > { %s221_s12 = scalar_lea.hbm %s1284_s1, %s1103_s7  ;;  %s817_s10 = scalar_lea.vmem %s816_s26, 256 }
  0x21   : > { %p813_p5 = pnand %p811_p4, %p799_p3  ;;  %p818_p7 = scmp.lt.s32.totalorder %s224_s14, %s816_s26 }
  0x22   : > { %p819_p10 = scmp.lt.s32.totalorder %s817_s10, %s810_s24 }
  0x23   : > { %p814_p6 = pneg %p813_p5 }
  0x24   : > { %p820_p13 = por %p819_p10, %p818_p7 }
  0x26   : > { %p821_p12 = pnand %p820_p13, %p814_p6 }
  0x28   : > { %824 = shalt.err (!%p821_p12)
}
  0x29   : > { %730 = dma.hbm_to_vmem [thread:$0]  (!%p1107_p0), %s221_s12, 128, %s224_s14, %s1119_s22  }
  0x2a   : > { %p1133_p4 = pnand %p685_p1, %p246_p2  ;;  %s203_s24 = scalar_lea.hbm %s1267_s0, %s1103_s7 }
  0x2b   : > { %s197_s25 = scalar_lea.vmem [#allocation2], %s1100_s6  ;;  %s239_s1 = scalar_lea.hbm %s1269_s2, %s1103_s7 }
  0x2c   : > { %s205_s26 = sshll.u32 %s197_s25, 4  ;;  %s1286_s23 = sand.u32 1, %s983_s17   ;;  %s206_s26 = int_to_ptr.vmem [resolvable:$true] %s205_s26 }
  0x2d   : > { %s194_s19 = scalar_lea.sflag [#allocation3], %s1286_s23  ;;  %s838_s12 = scalar_lea.vmem %s206_s26, 128 }
  0x2e   : > { %p839_p12 = scmp.ne.s32.totalorder %s206_s26, %s838_s12  ;;  %s998_s14 = smov [#allocation2]  }
  0x2f   : > { %s843_s29 = sshll.u32 %s998_s14, 4  ;;  %s844_s29 = int_to_ptr.vmem [resolvable:$false] %s843_s29 }
  0x30   : > { %p841_p1 = pnand %p839_p12, %p799_p3  ;;  %s845_s11 = scalar_lea.vmem %s844_s29, 256 }
  0x31   : > { %p846_p5 = scmp.lt.s32.totalorder %s206_s26, %s844_s29  ;;  %p847_p6 = scmp.lt.s32.totalorder %s845_s11, %s838_s12 }
  0x32   : > { %p842_p2 = pneg %p841_p1 }
  0x33   : > { %p848_p7 = por %p847_p6, %p846_p5 }
  0x35   : > { %p849_p10 = pnand %p848_p7, %p842_p2 }
  0x37   : > { %852 = shalt.err (!%p849_p10)
}
  0x38   : > { %727 = dma.hbm_to_vmem [thread:$0]  (!%p1107_p0), %s203_s24, 128, %s206_s26, %s194_s19  }
  0x39   : > { %s234_s23 = scalar_lea.vmem [#allocation7], %s1100_s6  ;;  %s999_s25 = smov [#allocation7]  }
  0x3a   : > { %s241_s5 = sshll.u32 %s234_s23, 4  ;;  %s871_s29 = sshll.u32 %s999_s25, 4  ;;  %s242_s5 = int_to_ptr.vmem [resolvable:$true] %s241_s5  ;;  %s872_s29 = int_to_ptr.vmem [resolvable:$false] %s871_s29 }
  0x3b   : > { %s866_s13 = scalar_lea.vmem %s242_s5, 128  ;;  %s873_s10 = scalar_lea.vmem %s872_s29, 256 }
  0x3c   : > { %p867_p13 = scmp.ne.s32.totalorder %s242_s5, %s866_s13  ;;  %p874_p2 = scmp.lt.s32.totalorder %s242_s5, %s872_s29 }
  0x3d   : > { %p875_p5 = scmp.lt.s32.totalorder %s873_s10, %s866_s13 }
  0x3e   : > { %p869_p12 = pnand %p867_p13, %p799_p3 }
  0x3f   : > { %p876_p6 = por %p875_p5, %p874_p2 }
  0x40   : > { %p870_p1 = pneg %p869_p12 }
  0x42   : > { %p877_p7 = pnand %p876_p6, %p870_p1 }
  0x44   : > { %880 = shalt.err (!%p877_p7)
}
  0x45   : > { %733 = dma.hbm_to_vmem [thread:$0]  (!%p1107_p0), %s239_s1, 128, %s242_s5, %s1119_s22  }
  0x46   : > { %250 = sbr.rel (%p1133_p4) target bundleno = 803 (0x323), region = 32  ;;  %s1168_s24 = sand.u32 (!%p1133_p4), 1, %s979_s16  }
  0x47   : > { %s1171_s26 = sshll.u32 (!%p1133_p4), %s1168_s24, 3  ;;  %s253_s8 = scalar_lea.sflag (!%p1133_p4), [#allocation3], %s1168_s24 }
  0x48   : > { %s256_s12 = scalar_lea.vmem (!%p1133_p4), [#allocation2], %s1171_s26 }
  0x4b   : > { %958 = dma.done.wait (%p1080_p8), %s253_s8, 128  }
  0x4c   : > { %960 = vsyncadd (%p1080_p8), %s253_s8, 4294967168  ;;  %s261_s1 = sand.u32 1, %s1060_s21   ;;  %s265_s22 = scalar_lea.vmem [#allocation5], %s1171_s26 }
  0x4d   : > { %s262_s7 = scalar_lea.sflag [#allocation6], %s261_s1 }
  0x4e   : > { %962 = dma.done.wait (%p1080_p8), %s262_s7, 256  }
  0x4f   : > { %964 = vsyncadd (%p1080_p8), %s262_s7, 4294967040  ;;  %v1000_v0 = vmov 0.0   ;;  %vm1001_vm0 = vmmov 0   ;;  %vm318_vm1 = vcmask 261120   ;;  %v316_v1 = vld [vmem:[%s265_s22] sm:$0xff]  ;;  %v314_v2 = vld [vmem:[%s256_s12] sm:$0xff] }
  0x50   : > { %704 = vmatprep.subr.mxu0 %v1000_v0  ;;  %706 = vmatprep.mubr.msk.f32.mxu0 %vm1001_vm0, %v1000_v0  ;;  %v315_v3 = vmul.f32 0.17677669, %v314_v2  ;;  %vm395_vm2 = vcmask 64512   ;;  %s274_s21 = scalar_lea.vmem [#allocation7], %s1171_s26  ;;  %s313_s27 = scalar_lea.vmem [#allocation9], %s1171_s26 }
  0x51   : > { %709 = vmatprep.subr.mxu1 %v1000_v0  ;;  %711 = vmatprep.mubr.msk.f32.mxu1 %vm1001_vm0, %v1000_v0  ;;  %v317_v12 = vld [vmem:[%s274_s21] sm:$0xff]  ;;  %s696_s9 = sshll.u32 %s987_s18, 7  ;;  %s519_s5 = sshll.u32 %s313_s27, 4  ;;  %s520_s5 = int_to_ptr.vmem [resolvable:$true] %s519_s5 }
  0x52   : > { %705 = vmatpush3.xpose.msk.msra.mxu0 %vm318_vm1, %v316_v1  ;;  %710 = vmatpush3.msra.mxu1 %v317_v12  ;;  %s517_s23 = scalar_lea.hbm %s1271_s4, %s696_s9  ;;  %s491_s13 = scalar_lea.sflag [#allocation10], %s1168_s24 }
  0x53   : > { %s881_s25 = scalar_lea.vmem %s520_s5, 128  ;;  %s1002_s29 = smov [#allocation9]  }
  0x54   : > { %p882_p8 = scmp.ne.s32.totalorder %s520_s5, %s881_s25  ;;  %s885_s10 = sshll.u32 %s1002_s29, 4  ;;  %s886_s10 = int_to_ptr.vmem [resolvable:$false] %s885_s10 }
  0x55   : > { %707 = vmatmul.mubr.msk.f32.vlgmr.msra.gmra.mxu0 %vm318_vm1, %v315_v3  ;;  %s887_s19 = scalar_lea.vmem %s886_s10, 256  ;;  %p888_p4 = scmp.lt.s32.totalorder %s520_s5, %s886_s10 }
  0x56   : > { %p883_p0 = pnand %p882_p8, %p1084_p9  ;;  %p889_p10 = scmp.lt.s32.totalorder %s887_s19, %s881_s25 }
  0x58   : > { %p884_p3 = pneg %p883_p0  ;;  %p890_p13 = por %p889_p10, %p888_p4 }
  0x5a   : > { %p891_p12 = pnand %p890_p13, %p884_p3 }
 0x115   : > { %v391_v4 = vpop.f32.mrf.mxu0 }
 0x116   : > { %v396_v5 = vsel %vm395_vm2, %v391_v4, -inf }
 0x117   : > { %397 = vmax.xlane.f32.xlu0 %v396_v5  ;;  %v708_v6 = vpop.f32.mrf.mxu0 }
 0x1a0   : > { %v398_v7 = vpop.xlane.xlu0 %397 }
 0x1a1   : > { %v399_v8 = vsub.f32 %v391_v4, %v398_v7 }
 0x1a3   : > { %v400_v9 = vmul.f32 1.442695, %v399_v8 }
 0x1a5   : > { %793 = vpow2.f32 %v400_v9 }
 0x1b2   : > { %v794_v10 = vpop.eup %793 }
 0x1b3   : > { %v402_v11 = vsel %vm395_vm2, %v794_v10, 0.0 }
 0x1b4   : > { %403 = vadd.xlane.f32.xlu0 %v402_v11 }
 0x23d   : > { %v404_v13 = vpop.xlane.xlu0 %403 }
 0x23e   : > { %795 = vrcp.f32 %v404_v13 }
 0x24b   : > { %v796_v14 = vpop.eup %795 }
 0x24c   : > { %v406_v15 = vmul.f32 %v796_v14, %v404_v13 }
 0x24e   : > { %v407_v16 = vsub.f32 2.0, %v406_v15 }
 0x250   : > { %v408_v17 = vmul.f32 %v796_v14, %v407_v16 }
 0x252   : > { %v409_v18 = vmul.f32 %v794_v10, %v408_v17 }
 0x254   : > { %712 = vmatmul.mubr.msk.f32.vlgmr.msra.gmra.mxu1 %vm395_vm2, %v409_v18  ;;  %410 = vst.msk [vmem:[%s313_s27] sm:$0xff] %vm395_vm2, %v409_v18 }
 0x255   : > { %894 = shalt.err (!%p891_p12)
}
 0x256   : > { %s895_s6 = scalar_lea.hbm %s517_s23, 128  ;;  %s899_s1 = scalar_lea.hbm %s1271_s4, 256 }
 0x257   : > { %p896_p1 = scmp.ne.s32.totalorder %s517_s23, %s895_s6  ;;  %p900_p6 = scmp.lt.s32.totalorder %s517_s23, %s1271_s4 }
 0x258   : > { %p901_p7 = scmp.lt.s32.totalorder %s899_s1, %s895_s6 }
 0x259   : > { %p897_p2 = pnand %p896_p1, %p1084_p9 }
 0x25a   : > { %p902_p8 = por %p901_p7, %p900_p6 }
 0x25b   : > { %p898_p5 = pneg %p897_p2 }
 0x25d   : > { %p903_p0 = pnand %p902_p8, %p898_p5 }
 0x25f   : > { %906 = shalt.err (!%p903_p0)
}
 0x260   : > { %721 = dma.vmem_to_hbm [thread:$0]  (%p1084_p9), %s520_s5, 128, %s517_s23, %s491_s13  }
 0x261   : > { %s306_s21 = scalar_lea.vmem [#allocation8], %s1171_s26  ;;  %s1218_s25 = scalar_lea.hbm %s1270_s3, %s696_s9 }
 0x262   : > { %s505_s27 = sshll.u32 %s306_s21, 4  ;;  %s486_s29 = scalar_lea.sflag [#allocation4], %s1168_s24  ;;  %s1220_s27 = int_to_ptr.vmem [resolvable:$true] %s505_s27 }
 0x263   : > { %s907_s10 = scalar_lea.vmem %s1220_s27, 128  ;;  %s1003_s18 = smov [#allocation8]  }
 0x264   : > { %p908_p3 = scmp.ne.s32.totalorder %s1220_s27, %s907_s10  ;;  %s911_s26 = sshll.u32 %s1003_s18, 4  ;;  %s912_s26 = int_to_ptr.vmem [resolvable:$false] %s911_s26 }
 0x265   : > { %s913_s9 = scalar_lea.vmem %s912_s26, 256  ;;  %p914_p13 = scmp.lt.s32.totalorder %s1220_s27, %s912_s26 }
 0x266   : > { %p909_p4 = pnand %p908_p3, %p1084_p9  ;;  %p915_p12 = scmp.lt.s32.totalorder %s913_s9, %s907_s10 }
 0x268   : > { %p910_p10 = pneg %p909_p4  ;;  %p916_p1 = por %p915_p12, %p914_p13 }
 0x26a   : > { %p917_p2 = pnand %p916_p1, %p910_p10 }
 0x314   : > { %v480_v19 = vpop.f32.mrf.mxu1 }
 0x315   : > { %484 = vst.msk [vmem:[%s306_s21] sm:$0xff] %vm318_vm1, %v480_v19 }
 0x316   : > { %v713_v20 = vpop.f32.mrf.mxu1 }
 0x317   : > { %920 = shalt.err (!%p917_p2)
}
 0x318   : > { %s921_s23 = scalar_lea.hbm %s1218_s25, 128  ;;  %s925_s13 = scalar_lea.hbm %s1270_s3, 256 }
 0x319   : > { %p922_p5 = scmp.ne.s32.totalorder %s1218_s25, %s921_s23  ;;  %p926_p8 = scmp.lt.s32.totalorder %s1218_s25, %s1270_s3 }
 0x31a   : > { %p927_p0 = scmp.lt.s32.totalorder %s925_s13, %s921_s23 }
 0x31b   : > { %p923_p6 = pnand %p922_p5, %p1084_p9 }
 0x31c   : > { %p928_p3 = por %p927_p0, %p926_p8 }
 0x31d   : > { %p924_p7 = pneg %p923_p6 }
 0x31f   : > { %p929_p4 = pnand %p928_p3, %p924_p7 }
 0x321   : > { %932 = shalt.err (!%p929_p4)
}
 0x322   : > { %720 = dma.vmem_to_hbm [thread:$0]  (%p1084_p9), %s1220_s27, 128, %s1218_s25, %s486_s29  }
 0x323 PF: > { %s531_s8 = sand.u32 1, %s975_s15   ;;  %p1287_p10 = scmp.ge.s32.totalorder %s995_s20, 2 }
 0x324   : > { %s532_s12 = scalar_lea.sflag [#allocation4], %s531_s8 }
 0x325   : > { %p735_p13 = pnand %p1287_p10, %p1091_p11 }
 0x327   : > { %p736_p12 = pneg %p735_p13 }
 0x329   : > { %966 = dma.done.wait (%p736_p12), %s532_s12, 128  }
 0x32a   : > { %968 = vsyncadd (%p736_p12), %s532_s12, 4294967168  ;;  %s541_s1 = scalar_lea.sflag [#allocation10], %s531_s8 }
 0x32b   : > { %970 = dma.done.wait (%p736_p12), %s541_s1, 128  }
 0x32c   : > { %972 = vsyncadd (%p736_p12), %s541_s1, 4294967168  ;;  %s27_s20 = sadd.s32 1, %s995_s20   ;;  %s1288_s28 = sld [smem:[#allocation17_spill]] }
 0x32d   : > { %p24_p1 = scmp.ge.s32.totalorder %s27_s20, 4   ;;  %s1289_s18 = sld [smem:[#allocation15_spill]] }
 0x32e   : > { %s1290_s19 = sld [smem:[#allocation16_spill]]  ;;  %s1291_s15 = smov %s979_s16 }
 0x32f   : > { %s1292_s16 = smov %s983_s17  ;;  %26 = sbr.rel (!%p24_p1) target bundleno = 12 (0xc), region = 118 }
 0x332   : > { %s1293_s17 = smov %s1288_s28 }
 0x334   :  { %546 = vsyncpa [#allocation3], 1 }
 0x335   :  { %548 = vsyncpa [#allocation3 + $0x1], 1 }
 0x336   :  { %549 = vsyncpa [#allocation6], 1 }
 0x337   :  { %551 = vsyncpa [#allocation6 + $0x1], 1 }
 0x338   :  { %552 = vsyncpa [#allocation4], 1 }
 0x339   :  { %554 = vsyncpa [#allocation4 + $0x1], 1 }
 0x33a   :  { %555 = vsyncpa [#allocation10], 1 }
 0x33b   :  { %557 = vsyncpa [#allocation10 + $0x1], 1 }

</bundles_post_ra>
